<compile_context>
chip_gen: v5e
topology: v5e:2x2
jax: 0.10.0
libtpu: 0.0.40
codegen_flags: <defaults>
</compile_context>

<pallas_src>
import jax
import jax.numpy as jnp
from jax.experimental import pallas as pl
from jax.experimental.pallas import tpu as pltpu

_MIB = 1024 * 1024
_STREAM_BUDGET = 24 * _MIB      # double-buffered x + out streamed tiles
_TOTAL_BUDGET = 36 * _MIB       # streams + resident weight/bias (fits v7x 64 MiB VMEM)
_VMEM_LIMIT_CAP = 40 * _MIB


def _cdiv(a, b):
    return -(-a // b)


def _round_up(a, m):
    return _cdiv(a, m) * m


def _nin_kernel(w_ref, x_ref, b_ref, o_ref):
    # w_ref: (t_co, c_in)   x_ref: (1, c_in, t_hw)
    # b_ref: (t_co, 1)      o_ref: (1, t_co, t_hw)
    acc = jnp.dot(w_ref[...], x_ref[0], preferred_element_type=jnp.float32)
    o_ref[0] = (acc + b_ref[...]).astype(o_ref.dtype)


def _nin_kernel_ksplit(w_ref, x_ref, b_ref, o_ref, acc_ref):
    # K-reduction variant: grid = (n, hw, co, k), k innermost / "arbitrary".
    # w_ref: (t_co, t_k)  x_ref: (1, t_k, t_hw)  b_ref: (t_co, 1)
    # o_ref: (1, t_co, t_hw)  acc_ref: (t_co, t_hw) f32
    k = pl.program_id(3)

    @pl.when(k == 0)
    def _():
        acc_ref[...] = jnp.zeros_like(acc_ref)

    acc_ref[...] += jnp.dot(w_ref[...], x_ref[0], preferred_element_type=jnp.float32)

    @pl.when(k == pl.num_programs(3) - 1)
    def _():
        o_ref[0] = (acc_ref[...] + b_ref[...]).astype(o_ref.dtype)


def _nin_forward_impl(x_nchw, v, g, bias, force_t_k=None):
    """x_nchw: (N, C_in, H, W); v: (C_out, C_in); g: (C_out,); bias: (C_out,)."""
    n, c_in, h, w = x_nchw.shape
    c_out = v.shape[0]
    hw = h * w
    itemsize = jnp.dtype(x_nchw.dtype).itemsize

    # --- weight-norm reparameterization in f32 (torch weight_norm, dim=0: row norm) ---
    v32 = v.astype(jnp.float32)
    row_norm = jnp.sqrt(jnp.sum(v32 * v32, axis=1, keepdims=True))
    w_eff = (g.astype(jnp.float32)[:, None] * v32 / row_norm).astype(x_nchw.dtype)
    b2d = bias.astype(jnp.float32).reshape(c_out, 1)

    # NCHW -> (N, C_in, H*W): contiguous collapse, no data movement.
    x_flat = x_nchw.reshape(n, c_in, hw)

    # --- output-channel tile: cap at 256 (no MXU benefit past M=256, bounded VMEM) ---
    t_co = min(c_out, 256)
    n_co = _cdiv(c_out, t_co)

    # --- decide whether C_in needs a reduction (K) split ---
    w_resident_bytes = 2 * t_co * c_in * itemsize            # worst case (double-buffered)
    min_stream_bytes = 2 * (c_in + t_co) * 128 * itemsize    # minimal 128-lane tiles
    use_k_split = (force_t_k is not None) or (
        w_resident_bytes + min_stream_bytes > _TOTAL_BUDGET)

    if not use_k_split:
        resident_wb = (n_co == 1)            # weight/bias never change -> single buffer
        w_bufs = 1 if resident_wb else 2
        fixed_bytes = w_bufs * t_co * c_in * itemsize + 2 * t_co * 4

        # streamed bytes per lane column: x (2 buffers) + out (2 buffers)
        per_col = 2 * (c_in + t_co) * itemsize
        if hw < 128 or hw * per_col <= _STREAM_BUDGET:
            t_hw = hw                        # full spatial row: one contiguous DMA
        else:
            t_hw = max(128, (_STREAM_BUDGET // per_col) // 128 * 128)
        n_hw = _cdiv(hw, t_hw)

        # keep >=2 steps on a parallel axis so both v7x TensorCores get work
        if n == 1 and n_co == 1 and n_hw == 1 and hw >= 256:
            t_hw = _round_up(_cdiv(hw, 2), 128)
            n_hw = _cdiv(hw, t_hw)

        grid = (n, n_hw, n_co)
        pipe = {"pipeline_mode": pl.Buffered(1)} if resident_wb else {}
        in_specs = [
            pl.BlockSpec((t_co, c_in), lambda b, j, co: (co, 0), **pipe),
            pl.BlockSpec((1, c_in, t_hw), lambda b, j, co: (b, 0, j)),
            pl.BlockSpec((t_co, 1), lambda b, j, co: (co, 0), **pipe),
        ]
        out_spec = pl.BlockSpec((1, t_co, t_hw), lambda b, j, co: (b, co, j))
        scratch = []
        kernel = _nin_kernel
        semantics = ("parallel", "parallel", "parallel")
        total_bytes = fixed_bytes + per_col * t_hw
    else:
        # --- K tile: lane dim of the weight block -> multiple of 128 ---
        if force_t_k is not None:
            t_k = int(force_t_k)
        else:
            t_k = (12 * _MIB) // (2 * itemsize * (t_co + 512))
            t_k = max(128, min(_round_up(c_in, 128), (t_k // 128) * 128))
        c_in_pad = _round_up(c_in, t_k)
        if c_in_pad != c_in:
            # zero-pad the contraction dim so every K block is full (zeros are no-ops)
            x_flat = jnp.pad(x_flat, ((0, 0), (0, c_in_pad - c_in), (0, 0)))
            w_eff = jnp.pad(w_eff, ((0, 0), (0, c_in_pad - c_in)))
        n_k = c_in_pad // t_k

        per_col = 2 * (t_k + t_co) * itemsize + 4 * t_co   # x + out streams + f32 acc
        fixed_bytes = 2 * t_co * t_k * itemsize + 2 * t_co * 4
        if hw < 128 or hw * per_col <= _STREAM_BUDGET:
            t_hw = hw
        else:
            t_hw = max(128, (_STREAM_BUDGET // per_col) // 128 * 128)
        n_hw = _cdiv(hw, t_hw)

        grid = (n, n_hw, n_co, n_k)
        in_specs = [
            pl.BlockSpec((t_co, t_k), lambda b, j, co, k: (co, k)),
            pl.BlockSpec((1, t_k, t_hw), lambda b, j, co, k: (b, k, j)),
            pl.BlockSpec((t_co, 1), lambda b, j, co, k: (co, 0)),
        ]
        out_spec = pl.BlockSpec((1, t_co, t_hw), lambda b, j, co, k: (b, co, j))
        scratch = [pltpu.VMEM((t_co, t_hw), jnp.float32)]
        kernel = _nin_kernel_ksplit
        semantics = ("parallel", "parallel", "parallel", "arbitrary")
        total_bytes = fixed_bytes + per_col * t_hw

    # vmem limit derived from actual tile bytes (+margin), capped well under v7x's 64 MiB
    vmem_limit = min(_VMEM_LIMIT_CAP, max(int(total_bytes) + 8 * _MIB, 16 * _MIB))

    out_flat = pl.pallas_call(
        kernel,
        out_shape=jax.ShapeDtypeStruct((n, c_out, hw), x_nchw.dtype),
        grid_spec=pltpu.PrefetchScalarGridSpec(
            num_scalar_prefetch=0,
            grid=grid,
            in_specs=in_specs,
            out_specs=out_spec,
            scratch_shapes=scratch,
        ),
        compiler_params=pltpu.CompilerParams(
            dimension_semantics=semantics,
            vmem_limit_bytes=vmem_limit,
        ),
    )(w_eff, x_flat, b2d)

    # (N, C_out, H*W) -> (N, C_out, H, W): free reshape, no transpose.
    return out_flat.reshape(n, c_out, h, w)


nin_forward = jax.jit(_nin_forward_impl, static_argnames=("force_t_k",))


def nin_reference(x_nchw, v, g, bias):
    row_norm = jnp.sqrt(jnp.sum(v ** 2, axis=1, keepdims=True))
    w_eff = g[:, None] * v / row_norm
    x_nhwc = jnp.transpose(x_nchw, (0, 2, 3, 1))
    out = jnp.einsum("nhwc,oc->nhwo", x_nhwc, w_eff) + bias
    return jnp.transpose(out, (0, 3, 1, 2))


if __name__ == "__main__":
    key = jax.random.PRNGKey(0)
    k1, k2, k3, k4 = jax.random.split(key, 4)

    N, C_IN, C_OUT, H, W = 2, 4, 8, 16, 16
    x = jax.random.normal(k1, (N, C_IN, H, W), dtype=jnp.float32)
    v = jax.random.normal(k2, (C_OUT, C_IN), dtype=jnp.float32) * 0.1
    g = jax.random.uniform(k3, (C_OUT,), dtype=jnp.float32, minval=0.5, maxval=1.5)
    bias = jax.random.normal(k4, (C_OUT,), dtype=jnp.float32) * 0.01

    out = nin_forward(x, v, g, bias)
    jax.block_until_ready(out)
    ref = nin_reference(x, v, g, bias)
    assert out.shape == (N, C_OUT, H, W), out.shape
    assert jnp.allclose(out, ref, atol=1e-5, rtol=1e-5), float(jnp.max(jnp.abs(out - ref)))

    # Exercise the large-C_in K-reduction path at a small size (forced t_k=128).
    k5, k6, k7, k8 = jax.random.split(jax.random.PRNGKey(1), 4)
    x2 = jax.random.normal(k5, (1, 192, 8, 8), dtype=jnp.float32)
    v2 = jax.random.normal(k6, (16, 192), dtype=jnp.float32) * 0.05
    g2 = jax.random.uniform(k7, (16,), dtype=jnp.float32, minval=0.5, maxval=1.5)
    b2 = jax.random.normal(k8, (16,), dtype=jnp.float32) * 0.01
    out2 = nin_forward(x2, v2, g2, b2, force_t_k=128)
    jax.block_until_ready(out2)
    ref2 = nin_reference(x2, v2, g2, b2)
    assert out2.shape == (1, 16, 8, 8), out2.shape
    assert jnp.allclose(out2, ref2, atol=1e-4, rtol=1e-4), float(jnp.max(jnp.abs(out2 - ref2)))

    print("KERNEL_OK")
</pallas_src>

<mosaic_0001>
module attributes {stable_mosaic.version = 11 : i64} {
  func.func @_nin_kernel(%arg0: i32, %arg1: i32, %arg2: i32, %arg3: memref<8x4xf32, #tpu.memory_space<vmem>>, %arg4: memref<1x4x256xf32, #tpu.memory_space<vmem>>, %arg5: memref<8x1xf32, #tpu.memory_space<vmem>>, %arg6: memref<1x8x256xf32, #tpu.memory_space<vmem>>) attributes {dimension_semantics = [#tpu.dimension_semantics<parallel>, #tpu.dimension_semantics<parallel>, #tpu.dimension_semantics<parallel>], iteration_bounds = array<i64: 2, 1, 1>, scalar_prefetch = 0 : i64, scratch_operands = 0 : i64, tpu.core_type = #tpu.core_type<tc>, window_params = [{pipeline_mode = #tpu.pipeline_mode<synchronous>, transform_indices = @transform_0, window_bounds = array<i64: 8, 4>}, {transform_indices = @transform_1, window_bounds = array<i64: 1, 4, 256>}, {pipeline_mode = #tpu.pipeline_mode<synchronous>, transform_indices = @transform_2, window_bounds = array<i64: 8, 1>}, {transform_indices = @transform_3, window_bounds = array<i64: 1, 8, 256>}]} {
    %c0 = arith.constant 0 : index
    %c0_0 = arith.constant 0 : index
    %0 = vector.load %arg3[%c0, %c0_0] : memref<8x4xf32, #tpu.memory_space<vmem>>, vector<8x4xf32>
    %c0_1 = arith.constant 0 : index
    %c0_2 = arith.constant 0 : index
    %c0_3 = arith.constant 0 : index
    %1 = vector.load %arg4[%c0_1, %c0_2, %c0_3] : memref<1x4x256xf32, #tpu.memory_space<vmem>>, vector<1x4x256xf32>
    %2 = vector.shape_cast %1 : vector<1x4x256xf32> to vector<4x256xf32>
    %cst = arith.constant dense<0.000000e+00> : vector<8x256xf32>
    %3 = tpu.matmul %0, %2, %cst {dimension_numbers = #tpu.dot_dimension_numbers<[1], [0], [0], [1], [0, 0, 1, 1], [], []>} : vector<8x4xf32>, vector<4x256xf32>, vector<8x256xf32> -> vector<8x256xf32>
    %c0_4 = arith.constant 0 : index
    %c0_5 = arith.constant 0 : index
    %4 = vector.load %arg5[%c0_4, %c0_5] : memref<8x1xf32, #tpu.memory_space<vmem>>, vector<8x1xf32>
    %5 = vector.broadcast %4 : vector<8x1xf32> to vector<8x256xf32>
    %6 = arith.addf %3, %5 : vector<8x256xf32>
    %c0_6 = arith.constant 0 : index
    %c0_7 = arith.constant 0 : index
    %c0_8 = arith.constant 0 : index
    %7 = vector.load %arg6[%c0_6, %c0_7, %c0_8] : memref<1x8x256xf32, #tpu.memory_space<vmem>>, vector<1x8x256xf32>
    %8 = vector.shape_cast %7 : vector<1x8x256xf32> to vector<8x256xf32>
    %9 = vector.shape_cast %6 : vector<8x256xf32> to vector<1x8x256xf32>
    tpu.vector_store %arg6[%c0_6, %c0_7, %c0_8], %9 {strides = array<i32>} : memref<1x8x256xf32, #tpu.memory_space<vmem>>, vector<1x8x256xf32>,
    return
  }
  func.func @transform_0(%arg0: i32, %arg1: i32, %arg2: i32) -> (i32, i32) {
    %c0_i32 = arith.constant 0 : i32
    %c0_i32_0 = arith.constant 0 : i32
    return %arg2, %c0_i32 : i32, i32
  }
  func.func @transform_1(%arg0: i32, %arg1: i32, %arg2: i32) -> (i32, i32, i32) {
    %c0_i32 = arith.constant 0 : i32
    %c0_i32_0 = arith.constant 0 : i32
    return %arg0, %c0_i32, %arg1 : i32, i32, i32
  }
  func.func @transform_2(%arg0: i32, %arg1: i32, %arg2: i32) -> (i32, i32) {
    %c0_i32 = arith.constant 0 : i32
    %c0_i32_0 = arith.constant 0 : i32
    return %arg2, %c0_i32 : i32, i32
  }
  func.func @transform_3(%arg0: i32, %arg1: i32, %arg2: i32) -> (i32, i32, i32) {
    %c0_i32 = arith.constant 0 : i32
    return %arg0, %arg2, %arg1 : i32, i32, i32
  }
}

</mosaic_0001>

<bundles_post_ra>
// kernel: _nin_forward_impl.1
= control target key start
LH: loop header
LB: loop body
LE: loop exit
PB: predicated region body
PF: predicated region fallthrough
CT: control target
= control target key end

     0   :  { %s550_s12 = smov 0   ;;  %s552_s13 = smov 0   ;;  %s589_s0 = inlined_call_operand.vmem [shape: f32[8,4], index: 0, kind: input, shape index: {}]   ;;  %s590_s1 = inlined_call_operand.vmem [shape: f32[2,4,256], index: 1, kind: input, shape index: {}]   ;;  %s591_s2 = inlined_call_operand.vmem [shape: f32[8,1], index: 2, kind: input, shape index: {}]   ;;  %s592_s3 = inlined_call_operand.vmem [shape: f32[2,8,256], index: 3, kind: output, shape index: {}]  }
   0x1   :  { %s554_s14 = smov 0  }
   0x2 LB: > { %s32_s15 = sadd.s32 1, %s523_s13  ;;  %p466_p0 = scmp.ge.s32.totalorder %s527_s14, 1  ;;  %s527_s14 = sphi %s554_s14, %s13_s14   ;;  %s523_s13 = sphi %s552_s13, %s594_s13   ;;  %s519_s12 = sphi %s550_s12, %s593_s12  }
   0x3   : > { %p34_p1 = scmp.ge.s32.totalorder %s32_s15, 2  ;;  %p185_p2 = scmp.lt.s32.totalorder %s527_s14, 3 }
   0x5   : > { %s596_s15 = smov (%p34_p1, %s32_s15), 0  ;;  %p186_p3 = pnand %p466_p0, %p185_p2 }
   0x6   : > { %p234_p4 = scmp.lt.s32.totalorder (!%p186_p3), %s519_s12, 1 }
   0x7   : > { %189 = sbr.rel (%p186_p3) target bundleno = 155 (0x9b), region = 32 }
   0xc   : > { %v263_v0 = vld [vmem:[%s591_s2] sm:$0xff]  ;;  %v529_v1 = vmov 0   ;;  %s598_s12 = smov (!%p234_p4, %s519_s12), 1  ;;  %vm277_vm0 = vcmask 1043456   ;;  %vm273_vm1 = vcmask 31744  }
   0xd   : > { %504 = vset.pattern.permute.xlu0 %v529_v1  ;;  %s477_s18 = sshll.u32 %s598_s12, 3  ;;  %v261_v3 = vld [vmem:[%s589_s0] sm:$0xff]  ;;  %s478_s24 = sshll.u32 %s598_s12, 4 }
   0xe   : > { %266 = vperm.xlu0 %504, %v263_v0   ;;  %s241_s21 = scalar_lea.vmem %s590_s1, %s477_s18  ;;  %s259_s27 = scalar_lea.vmem %s592_s3, %s478_s24 }
   0xf   : > { %v262_v2 = vld [vmem:[%s241_s21] sm:$0xff] }
  0x10   : > { %270 = vst [vmem:[#allocation1] ss:$2 sm:$0xff] %v262_v2 }
  0x17   : > { %v271_v4 = vld.sshfl [vmem:[#allocation1] sm:$0xff pattern:$0x75316420]  ;;  %v272_v5 = vld.sshfl [vmem:[#allocation1 + $0x8] sm:$0xff pattern:$0x75316420] }
  0x18   : > { %471 = vmatpush.msk.msra.mxu0 %vm277_vm0, %v271_v4  ;;  %473 = vmatpush.msk.msra.mxu1 %vm277_vm0, %v272_v5 }
  0x19   : > { %472 = vmatmul.msk.f32.vlgmr.msra.gmra.mxu0 %vm273_vm1, %v261_v3  ;;  %474 = vmatmul.msk.f32.vlgmr.msra.gmra.mxu1 %vm273_vm1, %v261_v3 }
  0x80   : > { %v267_v6 = vpop.permute.xlu0 %266 }
  0x96   : > { %v299_v7 = vpop.f32.mrf.mxu0  ;;  %v319_v8 = vpop.f32.mrf.mxu1 }
  0x97   : > { %v300_v9 = vadd.f32 %v299_v7, %v267_v6  ;;  %v320_v10 = vadd.f32 %v319_v8, %v267_v6 }
  0x99   : > { %322 = vst [vmem:[%s259_s27] sm:$0xff] %v300_v9 }
  0x9a   : > { %323 = vst [vmem:[%s259_s27 + $0x8] sm:$0xff] %v320_v10 }
  0x9b PF: > { %s13_s14 = sadd.s32 1, %s527_s14   ;;  %s593_s12 = smov %s523_s13 }
  0x9c   : > { %p10_p5 = scmp.ge.s32.totalorder %s13_s14, 4   ;;  %s594_s13 = smov %s596_s15 }
  0x9e   :  { %12 = sbr.rel (!%p10_p5) target bundleno = 2 (0x2), region = 68 }

</bundles_post_ra>
